<compile_context>
chip_gen: v7x
topology: tpu7x:2x2x1
jax: 0.10.0
libtpu: 0.0.40
codegen_flags: <defaults>
</compile_context>

<pallas_src>
import jax
import jax.numpy as jnp
from jax import lax
from jax.experimental import pallas as pl
from jax.experimental.pallas import tpu as pltpu


# ---------------------------------------------------------------------------
# Pallas kernel: 1x1 conv tile (small GEMM) + fused PReLU epilogue
# ---------------------------------------------------------------------------
def _conv1x1_prelu_kernel(x_ref, w_ref, slope_ref, o_ref):
    # x_ref:     (Bb, Cin, T)   VMEM tile (T = lane-dense spatial tile)
    # w_ref:     (Cout, Cin)    VMEM (tiny, resident every step)
    # slope_ref: (1,)           SMEM scalar (PReLU slope)
    # o_ref:     (Bb, Cout, T)  VMEM output tile
    w = w_ref[...]                                              # (Cout, Cin)
    s = slope_ref[0]
    bb = x_ref.shape[0]
    for b in range(bb):                                         # static unroll
        acc = jnp.dot(w, x_ref[b], preferred_element_type=jnp.float32)
        o_ref[b] = jnp.where(acc >= 0, acc, s * acc).astype(o_ref.dtype)


# ---------------------------------------------------------------------------
# Tiling heuristics
# ---------------------------------------------------------------------------
def _pick_hw_tile(hw_pad, max_lanes):
    """Largest multiple of 128 that divides hw_pad (hw_pad % 128 == 0), <= cap."""
    cap = max(128, (int(max_lanes) // 128) * 128)
    t = min(cap, hw_pad)
    t -= t % 128
    while hw_pad % t != 0:
        t -= 128
    return t


def _pick_batch_block(n, cin, cout, t, dtype_bytes, spatial_steps,
                      target_step_bytes=512 * 1024, min_steps=4,
                      max_unroll=16):
    """Largest divisor of n (<= max_unroll) that keeps total grid steps >=
    min_steps and pushes per-step DMA toward target_step_bytes."""
    best = 1
    for bb in range(1, min(n, max_unroll) + 1):
        if n % bb:
            continue
        steps = (n // bb) * spatial_steps
        if bb > 1 and steps < min_steps:
            break
        best = bb
        if bb * (cin + cout) * t * dtype_bytes >= target_step_bytes:
            break
    return best


# ---------------------------------------------------------------------------
# Wrapper
# ---------------------------------------------------------------------------
def transition_forward(x_nchw, w_oihw, prelu_slope, *, max_lanes=8192):
    """out = PReLU(Conv2d_1x1(x)); x NCHW, weight (Cout, Cin, 1, 1), no bias.

    max_lanes: cap on the flattened-spatial tile width (multiple of 128).
    8192 works well on v5e/v6e/v7x; raise to 16384 on very large images.
    """
    n, cin, h, w = x_nchw.shape
    cout = w_oihw.shape[0]
    assert w_oihw.shape == (cout, cin, 1, 1)
    dtype = x_nchw.dtype
    dtype_bytes = jnp.dtype(dtype).itemsize

    hw = h * w
    hw_pad = ((hw + 127) // 128) * 128          # lane-dense spatial axis
    x3 = x_nchw.reshape(n, cin, hw)             # free, contiguous reshape
    if hw_pad != hw:
        x3 = jnp.pad(x3, ((0, 0), (0, 0), (0, hw_pad - hw)))

    t = _pick_hw_tile(hw_pad, max_lanes)
    spatial_steps = hw_pad // t
    bb = _pick_batch_block(n, cin, cout, t, dtype_bytes, spatial_steps)
    grid = (n // bb, spatial_steps)

    wm = w_oihw.reshape(cout, cin).astype(dtype)
    slope = jnp.asarray(prelu_slope, jnp.float32).reshape(-1)[:1]

    cost = pl.CostEstimate(
        flops=2 * n * hw * cin * cout,
        transcendentals=0,
        bytes_accessed=n * hw * (cin + cout) * dtype_bytes
                       + cout * cin * dtype_bytes,
    )

    out3 = pl.pallas_call(
        _conv1x1_prelu_kernel,
        out_shape=jax.ShapeDtypeStruct((n, cout, hw_pad), dtype),
        grid_spec=pltpu.PrefetchScalarGridSpec(
            num_scalar_prefetch=0,
            grid=grid,
            in_specs=[
                # activation tile: (Bb, Cin, T), lane axis = flattened H*W
                pl.BlockSpec((bb, cin, t), lambda i, j: (i, 0, j)),
                # tiny weight, same block every step (stays resident in VMEM)
                pl.BlockSpec((cout, cin), lambda i, j: (0, 0)),
                # PReLU slope: scalar in SMEM (no VMEM/DMA slot wasted)
                pl.BlockSpec(memory_space=pltpu.MemorySpace.SMEM),
            ],
            out_specs=pl.BlockSpec((bb, cout, t), lambda i, j: (i, 0, j)),
        ),
        compiler_params=pltpu.CompilerParams(
            dimension_semantics=("parallel", "parallel"),
            vmem_limit_bytes=48 * 1024 * 1024,   # headroom under v7x's 64 MiB
        ),
        cost_estimate=cost,
    )(x3, wm, slope)

    if hw_pad != hw:
        out3 = out3[:, :, :hw]
    return out3.reshape(n, cout, h, w)


# ---------------------------------------------------------------------------
# Pure-JAX reference (lax conv) for correctness check
# ---------------------------------------------------------------------------
def _ref_forward(x, w_oihw, slope):
    y = lax.conv_general_dilated(
        x, w_oihw, window_strides=(1, 1), padding="VALID",
        dimension_numbers=("NCHW", "OIHW", "NCHW"))
    return jnp.where(y >= 0, y, slope * y)


# ---------------------------------------------------------------------------
if __name__ == "__main__":
    num_input_features, num_output_features = 4, 8
    n, h, w = 2, 16, 16

    key = jax.random.PRNGKey(0)
    k0, k1 = jax.random.split(key)

    x = jax.random.normal(k0, (n, num_input_features, h, w), jnp.float32)
    # Conv2d(in=4, out=8, k=1, bias=False) weight: (Cout, Cin, 1, 1)
    w_conv = 0.1 * jax.random.normal(
        k1, (num_output_features, num_input_features, 1, 1), jnp.float32)
    # nn.PReLU() default: single parameter initialized to 0.25
    prelu = jnp.array([0.25], jnp.float32)

    out = jax.block_until_ready(transition_forward(x, w_conv, prelu))
    assert out.shape == (n, num_output_features, h, w), out.shape

    ref = _ref_forward(x, w_conv, prelu[0])
    assert jnp.allclose(out, ref, atol=1e-4, rtol=1e-4), float(
        jnp.max(jnp.abs(out - ref)))

    print("KERNEL_OK")
</pallas_src>

<mosaic_0001>
module attributes {stable_mosaic.version = 11 : i64} {
  func.func @_conv1x1_prelu_kernel(%arg0: i32, %arg1: i32, %arg2: memref<1x4x256xf32, #tpu.memory_space<vmem>>, %arg3: memref<8x4xf32, #tpu.memory_space<vmem>>, %arg4: memref<1xf32, #tpu.memory_space<smem>>, %arg5: memref<1x8x256xf32, #tpu.memory_space<vmem>>) attributes {dimension_semantics = [#tpu.dimension_semantics<parallel>, #tpu.dimension_semantics<parallel>], iteration_bounds = array<i64: 2, 1>, scalar_prefetch = 0 : i64, scratch_operands = 0 : i64, tpu.core_type = #tpu.core_type<tc>, window_params = [{transform_indices = @transform_0, window_bounds = array<i64: 1, 4, 256>}, {pipeline_mode = #tpu.pipeline_mode<synchronous>, transform_indices = @transform_1, window_bounds = array<i64: 8, 4>}, {transform_indices = @transform_2, window_bounds = array<i64: 1>}, {transform_indices = @transform_3, window_bounds = array<i64: 1, 8, 256>}]} {
    %c0 = arith.constant 0 : index
    %c0_0 = arith.constant 0 : index
    %0 = vector.load %arg3[%c0, %c0_0] : memref<8x4xf32, #tpu.memory_space<vmem>>, vector<8x4xf32>
    %c0_1 = arith.constant 0 : index
    %1 = memref.load %arg4[%c0_1] : memref<1xf32, #tpu.memory_space<smem>>
    %c0_2 = arith.constant 0 : index
    %c0_3 = arith.constant 0 : index
    %c0_4 = arith.constant 0 : index
    %2 = vector.load %arg2[%c0_2, %c0_3, %c0_4] : memref<1x4x256xf32, #tpu.memory_space<vmem>>, vector<1x4x256xf32>
    %3 = vector.shape_cast %2 : vector<1x4x256xf32> to vector<4x256xf32>
    %cst = arith.constant dense<0.000000e+00> : vector<8x256xf32>
    %4 = tpu.matmul %0, %3, %cst {dimension_numbers = #tpu.dot_dimension_numbers<[1], [0], [0], [1], [0, 0, 1, 1], [], []>} : vector<8x4xf32>, vector<4x256xf32>, vector<8x256xf32> -> vector<8x256xf32>
    %cst_5 = arith.constant 0.000000e+00 : f32
    %5 = vector.broadcast %cst_5 : f32 to vector<8x256xf32>
    %6 = arith.cmpf oge, %4, %5 : vector<8x256xf32>
    %7 = vector.broadcast %1 : f32 to vector<8x256xf32>
    %8 = arith.mulf %7, %4 : vector<8x256xf32>
    %9 = arith.select %6, %4, %8 : vector<8x256xi1>, vector<8x256xf32>
    %c0_6 = arith.constant 0 : index
    %c0_7 = arith.constant 0 : index
    %c0_8 = arith.constant 0 : index
    %10 = vector.load %arg5[%c0_6, %c0_7, %c0_8] : memref<1x8x256xf32, #tpu.memory_space<vmem>>, vector<1x8x256xf32>
    %11 = vector.shape_cast %10 : vector<1x8x256xf32> to vector<8x256xf32>
    %12 = vector.shape_cast %9 : vector<8x256xf32> to vector<1x8x256xf32>
    tpu.vector_store %arg5[%c0_6, %c0_7, %c0_8], %12 {strides = array<i32>} : memref<1x8x256xf32, #tpu.memory_space<vmem>>, vector<1x8x256xf32>,
    return
  }
  func.func @transform_0(%arg0: i32, %arg1: i32) -> (i32, i32, i32) {
    %c0_i32 = arith.constant 0 : i32
    %c0_i32_0 = arith.constant 0 : i32
    return %arg0, %c0_i32, %arg1 : i32, i32, i32
  }
  func.func @transform_1(%arg0: i32, %arg1: i32) -> (i32, i32) {
    %c0_i32 = arith.constant 0 : i32
    %c0_i32_0 = arith.constant 0 : i32
    %c0_i32_1 = arith.constant 0 : i32
    return %c0_i32, %c0_i32_0 : i32, i32
  }
  func.func @transform_2(%arg0: i32, %arg1: i32) -> i32 {
    %c0_i32 = arith.constant 0 : i32
    %c0_i32_0 = arith.constant 0 : i32
    return %c0_i32 : i32
  }
  func.func @transform_3(%arg0: i32, %arg1: i32) -> (i32, i32, i32) {
    %c0_i32 = arith.constant 0 : i32
    %c0_i32_0 = arith.constant 0 : i32
    return %arg0, %c0_i32, %arg1 : i32, i32, i32
  }
}

</mosaic_0001>

<bundles_post_ra>
// kernel: tpu_custom_call.1
= control target key start
LH: loop header
LB: loop body
LE: loop exit
PB: predicated region body
PF: predicated region fallthrough
CT: control target
= control target key end

     0   :  { %s803_s0 = inlined_call_operand.hbm [shape: f32[2,4,256], index: 0, kind: input, shape index: {}]   ;;  %s804_s1 = inlined_call_operand.vmem [shape: f32[8,4], index: 1, kind: input, shape index: {}]   ;;  %s805_s2 = inlined_call_operand.<no memory space> [shape: f32[1], index: 2, kind: input, shape index: {}]   ;;  %s806_s3 = inlined_call_operand.hbm [shape: f32[2,8,256], index: 3, kind: output, shape index: {}]  }
   0x1   :  { %8 = sst [smem:[#allocation2]] %s805_s2 }
   0x2   :  { %9 = vsyncpa [#allocation4], 0 }
   0x3   :  { %11 = vsyncpa [#allocation4 + $0x1], 0 }
   0x4   :  { %12 = vsyncpa [#allocation5], 0 }
   0x5   :  { %14 = vsyncpa [#allocation5 + $0x1], 0  ;;  %s627_s14 = smov 0   ;;  %s629_s15 = smov 0  }
   0x6   :  { %s631_s16 = smov 0   ;;  %s633_s17 = smov 0  }
   0x7   :  { %s635_s18 = smov 0   ;;  %s637_s19 = smov 0  }
   0x8 LB: > { %s403_s2 = sadd.s32 4294967295, %s599_s19   ;;  %s404_s20 = sadd.s32 4294967294, %s599_s19   ;;  %s599_s19 = sphi %s637_s19, %s20_s19   ;;  %s595_s18 = sphi %s635_s18, %s822_s18   ;;  %s591_s17 = sphi %s633_s17, %s821_s17   ;;  %s587_s16 = sphi %s631_s16, %s820_s16   ;;  %s583_s15 = sphi %s629_s15, %s819_s15   ;;  %s579_s14 = sphi %s627_s14, %s818_s14  }
   0x9   : > { %s32_s21 = sadd.s32 1, %s595_s18  ;;  %s41_s22 = sadd.s32 1, %s587_s16 }
   0xa   : > { %p34_p0 = scmp.ge.s32.totalorder %s32_s21, 2  ;;  %p48_p1 = scmp.ne.s32.totalorder %s587_s16, %s583_s15 }
   0xb   : > { %p49_p2 = scmp.eq.s32.totalorder %s599_s19, 0  ;;  %p54_p3 = scmp.ne.s32.totalorder %s583_s15, %s579_s14 }
   0xc   : > { %s824_s21 = smov (%p34_p0, %s32_s21), 0  ;;  %p55_p5 = scmp.eq.s32.totalorder %s403_s2, 0 }
   0xd   : > { %p668_p4 = por %p49_p2, %p48_p1  ;;  %s36_s24 = ssub.s32 %s595_s18, %s824_s21 }
   0xe   : > { %p122_p6 = scmp.eq.s32.totalorder %s403_s2, 1  ;;  %p39_p7 = scmp.eq.s32.totalorder %s36_s24, 0 }
   0xf   : > { %p674_p8 = por %p55_p5, %p54_p3  ;;  %p128_p10 = scmp.eq.s32.totalorder %s404_s20, 1 }
  0x10   : > { %p678_p9 = por %p122_p6, %p48_p1  ;;  %p435_p13 = scmp.lt.s32.totalorder %s599_s19, 2 }
  0x11   : > { %s683_s27 = scalar_select %p39_p7, %s587_s16, %s41_s22  }
  0x12   : > { %s810_s26 = scalar_select %p678_p9, 1, 0 }
  0x13   : > { %p685_p11 = por %p128_p10, %p54_p3  ;;  %s154_s29 = sand.u32 1, %s587_s16  }
  0x14   : > { %s407_s30 = sshll.u32 %s154_s29, 3  ;;  %s421_s4 = sshll.u32 %s595_s18, 7 }
  0x15   : > { %s811_s28 = scalar_select %p685_p11, 1, 0 }
  0x16   : > { %s696_s7 = scalar_lea.hbm %s803_s0, %s421_s4  ;;  %s158_s8 = scalar_lea.vmem [#allocation3], %s407_s30 }
  0x17   : > { %s168_s9 = sshll.u32 %s158_s8, 4  ;;  %p702_p0 = pnand %p435_p13, %p668_p4  ;;  %s698_s9 = int_to_ptr.vmem [resolvable:$true] %s168_s9 }
  0x18   : > { %s155_s11 = scalar_lea.sflag [#allocation4], %s154_s29  ;;  %s487_s12 = scalar_lea.hbm %s696_s7, 128 }
  0x19   : > { %p488_p3 = scmp.ne.s32.totalorder %s696_s7, %s487_s12  ;;  %p489_p5 = pneg %p702_p0 }
  0x1a   : > { %s492_s20 = scalar_lea.hbm %s803_s0, 256  ;;  %p493_p4 = scmp.lt.u32.totalorder %s696_s7, %s803_s0 }
  0x1b   : > { %p490_p6 = pnand %p489_p5, %p488_p3  ;;  %p494_p10 = scmp.lt.u32.totalorder %s492_s20, %s487_s12 }
  0x1c   : > { %p496_p12 = scmp.lt.u32.totalorder %s487_s12, %s696_s7 }
  0x1d   : > { %p491_p7 = pneg %p490_p6  ;;  %p495_p13 = por %p494_p10, %p493_p4 }
  0x1f   : > { %p497_p1 = por %p496_p12, %p495_p13 }
  0x21   : > { %p498_p2 = pnand %p497_p1, %p491_p7 }
  0x23   : > { %501 = shalt.err (!%p498_p2)
}
  0x24   : > { %s502_s24 = scalar_lea.vmem %s698_s9, 128  ;;  %s601_s29 = smov [#allocation3]  }
  0x25   : > { %p503_p3 = scmp.ne.s32.totalorder %s698_s9, %s502_s24  ;;  %s507_s30 = sshll.u32 %s601_s29, 4  ;;  %s508_s30 = int_to_ptr.vmem [resolvable:$false] %s507_s30 }
  0x26   : > { %s509_s4 = scalar_lea.vmem %s508_s30, 256  ;;  %p510_p9 = scmp.lt.s32.totalorder %s698_s9, %s508_s30 }
  0x27   : > { %p505_p6 = pnand %p503_p3, %p489_p5  ;;  %p511_p4 = scmp.lt.s32.totalorder %s509_s4, %s502_s24 }
  0x29   : > { %p506_p11 = pneg %p505_p6  ;;  %p512_p10 = por %p511_p4, %p510_p9 }
  0x2b   : > { %p513_p12 = pnand %p512_p10, %p506_p11 }
  0x2d   : > { %516 = shalt.err (!%p513_p12)
}
  0x2e   : > { %430 = dma.hbm_to_vmem [thread:$0]  (!%p702_p0), %s696_s7, 128, %s698_s9, %s155_s11  }
  0x2f   : > { %p813_p1 = scmp.lt.s32.totalorder %s599_s19, 3  ;;  %p814_p2 = scmp.ge.s32.totalorder %s599_s19, 1 }
  0x31   : > { %p174_p5 = pnand %p814_p2, %p813_p1 }
  0x32   : > { %s738_s5 = sand.u32 (!%p174_p5), 1, %s583_s15  }
  0x33   : > { %177 = sbr.rel (%p174_p5) target bundleno = 294 (0x126), region = 32  ;;  %s411_s6 = sshll.u32 (!%p174_p5), %s738_s5, 3 }
  0x34   : > { %s180_s8 = scalar_lea.sflag (!%p174_p5), [#allocation4], %s738_s5  ;;  %s183_s12 = scalar_lea.vmem (!%p174_p5), [#allocation3], %s411_s6 }
  0x3a   : > { %570 = dma.done.wait (%p674_p8), %s180_s8, 128  }
  0x3b   : > { %572 = vsyncadd (%p674_p8), %s180_s8, 4294967168  ;;  %v602_v0 = vmov 0.0   ;;  %v210_v1 = vld [vmem:[%s183_s12] sm:$0xff]  ;;  %vm217_vm0 = vcmask 1043456   ;;  %vm213_vm1 = vcmask 31744   ;;  %s209_s10 = sld [smem:[#allocation2]] }
  0x3c   : > { %286 = vmatprep.mubr.f32.mxu0 %v602_v0  ;;  %v212_v2 = vcombine.high %v210_v1, %v210_v1  ;;  %v208_v3 = vld [vmem:[%s804_s1] sm:$0xff]  ;;  %s412_s11 = sshll.u32 %s738_s5, 4  ;;  %s422_s2 = sshll.u32 %s591_s17, 8 }
  0x3d   : > { %s205_s25 = scalar_lea.vmem [#allocation6], %s412_s11  ;;  %s754_s23 = scalar_lea.hbm %s806_s3, %s422_s2 }
  0x3e   : > { %413 = vmatprep.subr.msk.mxu0 %vm217_vm0, %v212_v2  ;;  %s319_s13 = sshll.u32 %s205_s25, 4  ;;  %s303_s17 = scalar_lea.sflag [#allocation5], %s738_s5  ;;  %s756_s13 = int_to_ptr.vmem [resolvable:$true] %s319_s13 }
  0x3f   : > { %414 = vmatpush1.msk.msra.mxu0 %vm217_vm0, %v210_v1  ;;  %s517_s24 = scalar_lea.vmem %s756_s13, 256  ;;  %p815_p9 = scmp.ne.s32.totalorder %s810_s26, 0 }
  0x40   : > { %415 = vmatmul.mubr.msk.f32.vlgmr.msra.gmra.mrb[0].mxu0 %vm213_vm1, %v208_v3  ;;  %p518_p8 = scmp.ne.s32.totalorder %s756_s13, %s517_s24  ;;  %s603_s29 = smov [#allocation6]  }
  0x41   : > { %v295_v4 = vstv %s209_s10  ;;  %s521_s30 = sshll.u32 %s603_s29, 4  ;;  %s522_s30 = int_to_ptr.vmem [resolvable:$false] %s521_s30 }
  0x42   : > { %p519_p11 = pnand %p518_p8, %p815_p9  ;;  %s523_s4 = scalar_lea.vmem %s522_s30, 512 }
  0x43   : > { %p524_p7 = scmp.lt.s32.totalorder %s756_s13, %s522_s30  ;;  %p525_p13 = scmp.lt.s32.totalorder %s523_s4, %s517_s24 }
  0x44   : > { %p520_p0 = pneg %p519_p11 }
  0x45   : > { %p526_p3 = por %p525_p13, %p524_p7 }
  0x47   : > { %p527_p6 = pnand %p526_p3, %p520_p0 }
 0x113   : > { %v288_v5 = vpop.f32.mrb[0].mxu0 }
 0x114   : > { %vm293_vm2 = vcmp.ge.f32.partialorder %v288_v5, 0.0  ;;  %v290_v6 = vpop.f32.mrb[1].mxu0  ;;  %v296_v7 = vmul.f32 %v295_v4, %v288_v5 }
 0x115   : > { %vm294_vm3 = vcmp.ge.f32.partialorder %v290_v6, 0.0  ;;  %v297_v8 = vmul.f32 %v295_v4, %v290_v6 }
 0x116   : > { %v298_v9 = vsel %vm293_vm2, %v288_v5, %v296_v7 }
 0x117   : > { %v299_v10 = vsel %vm294_vm3, %v290_v6, %v297_v8  ;;  %300 = vst [vmem:[%s205_s25] sm:$0xff] %v298_v9 }
 0x118   : > { %301 = vst [vmem:[%s205_s25 + $0x8] sm:$0xff] %v299_v10 }
 0x119   : > { %530 = shalt.err (!%p527_p6)
}
 0x11a   : > { %s531_s5 = scalar_lea.hbm %s754_s23, 256  ;;  %s535_s12 = scalar_lea.hbm %s806_s3, 512 }
 0x11b   : > { %p532_p4 = scmp.ne.s32.totalorder %s754_s23, %s531_s5  ;;  %p536_p1 = scmp.lt.u32.totalorder %s754_s23, %s806_s3 }
 0x11c   : > { %p537_p2 = scmp.lt.u32.totalorder %s535_s12, %s531_s5  ;;  %p539_p8 = scmp.lt.u32.totalorder %s531_s5, %s754_s23 }
 0x11d   : > { %p533_p10 = pnand %p532_p4, %p815_p9 }
 0x11e   : > { %p538_p5 = por %p537_p2, %p536_p1 }
 0x11f   : > { %p534_p12 = pneg %p533_p10 }
 0x120   : > { %p540_p11 = por %p539_p8, %p538_p5 }
 0x122   : > { %p541_p0 = pnand %p540_p11, %p534_p12 }
 0x124   : > { %544 = shalt.err (!%p541_p0)
}
 0x125   : > { %425 = dma.vmem_to_hbm [thread:$0]  (%p815_p9), %s756_s13, 256, %s754_s23, %s303_s17  }
 0x126 PF: > { %s331_s10 = sand.u32 1, %s579_s14   ;;  %p816_p7 = scmp.ne.s32.totalorder %s811_s28, 0 }
 0x127   : > { %p817_p13 = scmp.ge.s32.totalorder %s599_s19, 2  ;;  %s332_s11 = scalar_lea.sflag [#allocation5], %s331_s10 }
 0x129   : > { %p432_p3 = pnand %p817_p13, %p816_p7 }
 0x12b   : > { %574 = dma.done.wait (!%p432_p3), %s332_s11, 256  }
 0x12c   : > { %576 = vsyncadd (!%p432_p3), %s332_s11, 4294967040  ;;  %s20_s19 = sadd.s32 1, %s599_s19   ;;  %s818_s14 = smov %s583_s15 }
 0x12d   : > { %p17_p6 = scmp.ge.s32.totalorder %s20_s19, 4   ;;  %s819_s15 = smov %s587_s16 }
 0x12e   : > { %s820_s16 = smov %s683_s27  ;;  %s821_s17 = smov %s595_s18 }
 0x12f   : > { %s822_s18 = smov %s824_s21  ;;  %19 = sbr.rel (!%p17_p6) target bundleno = 8 (0x8), region = 77 }
 0x136   :  { %337 = vsyncpa [#allocation4], 1 }
 0x137   :  { %339 = vsyncpa [#allocation4 + $0x1], 1 }
 0x138   :  { %340 = vsyncpa [#allocation5], 1 }
 0x139   :  { %342 = vsyncpa [#allocation5 + $0x1], 1 }

</bundles_post_ra>
